<compile_context>
chip_gen: v6e
topology: v6e:2x2x1
jax: 0.10.0
libtpu: 0.0.40
codegen_flags: <defaults>
</compile_context>

<pallas_src>
import math
import jax
import jax.numpy as jnp
from jax.experimental import pallas as pl
from jax.experimental.pallas import tpu as pltpu


def make_sin_pe(d_model: int, seq_len: int, dtype=jnp.float32) -> jnp.ndarray:
    """Sinusoidal positional-encoding table, shape [seq_len, d_model]."""
    position = jnp.arange(seq_len, dtype=jnp.float32)[:, None]               # [S, 1]
    div_term = jnp.exp(
        jnp.arange(0, d_model, 2, dtype=jnp.float32) * (-math.log(10000.0) / d_model)
    )                                                                         # [ceil(D/2)]
    angles = position * div_term                                              # [S, ceil(D/2)]
    pe = jnp.zeros((seq_len, d_model), dtype=jnp.float32)
    pe = pe.at[:, 0::2].set(jnp.sin(angles))
    pe = pe.at[:, 1::2].set(jnp.cos(angles)[:, : d_model // 2])               # odd-D safe
    return pe.astype(dtype)


def _pe_add_kernel(x_ref, pe_ref, o_ref):
    # x_ref / o_ref: (TB, TR, 128) tiles; pe_ref: (TR, 128).
    # Single VPU add; pe broadcast over the (leading) batch-tile dim is free.
    o_ref[...] = x_ref[...] + pe_ref[...][None]


def _choose_tiles(B: int, R: int, C: int, itemsize: int, target_bytes: int):
    """Pick (TB, TR): a row tile near target_bytes; if a full (R, C) plane fits
    well under the target, also pack TB batch elements per grid step."""
    sublane = 8 * max(1, 4 // itemsize)       # 8 (f32), 16 (bf16), 32 (int8/fp8)
    row_bytes = C * itemsize
    plane_bytes = R * row_bytes

    # --- Row tile -----------------------------------------------------------
    tr = max(1, target_bytes // row_bytes)
    if tr >= R:
        tr = R                                 # full extent: always a legal block dim
    else:
        tr = max(sublane, (tr // sublane) * sublane)
        # Prefer TR dividing R (no ragged/masked last row tile), but don't
        # shrink the tile below ~half the target to find such a divisor.
        cand = tr
        while cand >= max(sublane, tr // 2):
            if R % cand == 0:
                tr = cand
                break
            cand -= sublane

    # --- Batch tile (only when a whole plane is small vs. the target) -------
    tb = 1
    if tr == R and plane_bytes > 0:
        tb = int(max(1, min(B, target_bytes // plane_bytes)))
        cand = tb
        while cand >= max(1, tb // 2):         # prefer TB dividing B (no ragged tail)
            if B % cand == 0:
                tb = cand
                break
            cand -= 1
    return tb, tr


def positional_encoding_sin(x: jnp.ndarray, pe: jnp.ndarray, *,
                            donate: bool = False,
                            target_bytes: int = 4 << 20) -> jnp.ndarray:
    """x: [B, S, D]; pe: [S_max, D] with S <= S_max. Returns x + pe[:S]."""
    B, S, D = x.shape
    if S > pe.shape[0]:
        raise ValueError(f"seq_len {S} exceeds pe table length {pe.shape[0]}")
    if pe.dtype != x.dtype:
        # Slow path; pre-cast / cache the table (see PositionalEncodingSin) so
        # this does not materialize a fresh copy on every forward.
        pe = pe.astype(x.dtype)
    pe_s = pe if S == pe.shape[0] else pe[:S]

    itemsize = jnp.dtype(x.dtype).itemsize
    n = S * D
    C = 128
    if n % C == 0:
        # Lane-dense view: flatten (S, D) -> (R, 128).  Free reshape (contiguous).
        R = n // C
        x_v = x.reshape(B, R, C)
        pe_v = pe_s.reshape(R, C)
        pad = 0
    else:
        # Lane-dense fallback: flatten and zero-pad the S*D plane up to a
        # multiple of 128 (<= 127 extra elems/plane) so every store is an
        # unmasked full-lane vst instead of a masked vst.msk partial store.
        pad = (-n) % C
        R = (n + pad) // C
        x_v = jnp.pad(x.reshape(B, n), ((0, 0), (0, pad))).reshape(B, R, C)
        pe_v = jnp.pad(pe_s.reshape(n), (0, pad)).reshape(R, C)

    TB, TR = _choose_tiles(B, R, C, itemsize, target_bytes)
    # Row tiles outer, batch inner: pe's index_map is independent of the inner
    # batch axis, so each pe tile is DMA'd once and reused across the batch.
    grid = (pl.cdiv(R, TR), pl.cdiv(B, TB))

    out = pl.pallas_call(
        _pe_add_kernel,
        out_shape=jax.ShapeDtypeStruct((B, R, C), x.dtype),
        grid_spec=pltpu.PrefetchScalarGridSpec(
            num_scalar_prefetch=0,
            grid=grid,
            in_specs=[
                pl.BlockSpec((TB, TR, C), lambda t, b: (b, t, 0)),   # x tile
                pl.BlockSpec((TR, C), lambda t, b: (t, 0)),          # pe tile (batch-invariant)
            ],
            out_specs=pl.BlockSpec((TB, TR, C), lambda t, b: (b, t, 0)),
        ),
        compiler_params=pltpu.CompilerParams(
            # Both axes parallel: on v7x the two TensorCores split whichever
            # axis has extent > 1 (row axis carries the split when B == 1).
            dimension_semantics=("parallel", "parallel"),
            # Worst-case live footprint ~6 x 4 MiB tiles = 24 MiB; 48 MiB leaves
            # headroom and stays under v7x's 64 MiB physical VMEM.
            vmem_limit_bytes=48 * 1024 * 1024,
        ),
        input_output_aliases=({0: 0} if donate else {}),
    )(x_v, pe_v)

    if pad:
        out = out.reshape(B, R * C)[:, :n]
    return out.reshape(B, S, D)


class PositionalEncodingSin:
    """JAX/Pallas port of the PyTorch module (pe_id=None path)."""

    def __init__(self, d_model: int, seq_len: int):
        self.d_model = d_model
        self.seq_len = seq_len
        # fp32 buffer, like the PyTorch register_buffer.
        self.pe = make_sin_pe(d_model, seq_len, dtype=jnp.float32)
        # Hoisted per-dtype cast cache: the cast happens once, not every forward.
        self._pe_cast = {jnp.dtype(jnp.float32).name: self.pe}

    def _table(self, dtype) -> jnp.ndarray:
        key = jnp.dtype(dtype).name
        if key not in self._pe_cast:
            self._pe_cast[key] = self.pe.astype(dtype)
        return self._pe_cast[key]

    def __call__(self, x: jnp.ndarray, pe_id=None, donate: bool = False) -> jnp.ndarray:
        if pe_id is not None:
            # TODO(synk): pe_id path (per-batch ragged gather of pe rows + in-place
            # update of a length-dependent prefix) not implemented; it requires a
            # data-dependent row gather / ragged writeback.
            raise NotImplementedError("pe_id path not implemented in the Pallas kernel")
        return positional_encoding_sin(x, self._table(x.dtype), donate=donate)


if __name__ == "__main__":
    key0, key1 = jax.random.split(jax.random.PRNGKey(0))

    # Case 1: lane-dense fast path (S*D % 128 == 0) with batch packing.
    batch, seq_len, d_model = 2, 8, 32
    module = PositionalEncodingSin(d_model, seq_len)
    x = jax.random.normal(key0, (batch, seq_len, d_model), dtype=jnp.float32)
    out = jax.block_until_ready(module(x))
    ref = x + module.pe[None, :seq_len, :]
    assert out.shape == (batch, seq_len, d_model)
    assert jnp.allclose(out, ref, atol=1e-6), "mismatch vs reference (fast path)"

    # Case 2: padded fallback path (S*D % 128 != 0) and S shorter than the table.
    d_model2, s2 = 24, 5
    module2 = PositionalEncodingSin(d_model2, seq_len)
    x2 = jax.random.normal(key1, (batch, s2, d_model2), dtype=jnp.float32)
    out2 = jax.block_until_ready(module2(x2))
    ref2 = x2 + module2.pe[None, :s2, :]
    assert out2.shape == (batch, s2, d_model2)
    assert jnp.allclose(out2, ref2, atol=1e-6), "mismatch vs reference (padded path)"

    print("KERNEL_OK")
</pallas_src>

<mosaic_0001>
module attributes {stable_mosaic.version = 11 : i64} {
  func.func @_pe_add_kernel(%arg0: i32, %arg1: i32, %arg2: memref<2x2x128xf32, #tpu.memory_space<vmem>>, %arg3: memref<2x128xf32, #tpu.memory_space<vmem>>, %arg4: memref<2x2x128xf32, #tpu.memory_space<vmem>>) attributes {dimension_semantics = [#tpu.dimension_semantics<parallel>, #tpu.dimension_semantics<parallel>], iteration_bounds = array<i64: 1, 1>, scalar_prefetch = 0 : i64, scratch_operands = 0 : i64, tpu.core_type = #tpu.core_type<tc>, window_params = [{transform_indices = @transform_0, window_bounds = array<i64: 2, 2, 128>}, {transform_indices = @transform_1, window_bounds = array<i64: 2, 128>}, {transform_indices = @transform_2, window_bounds = array<i64: 2, 2, 128>}]} {
    %c0 = arith.constant 0 : index
    %c0_0 = arith.constant 0 : index
    %c0_1 = arith.constant 0 : index
    %0 = vector.load %arg2[%c0, %c0_0, %c0_1] : memref<2x2x128xf32, #tpu.memory_space<vmem>>, vector<2x2x128xf32>
    %c0_2 = arith.constant 0 : index
    %c0_3 = arith.constant 0 : index
    %1 = vector.load %arg3[%c0_2, %c0_3] : memref<2x128xf32, #tpu.memory_space<vmem>>, vector<2x128xf32>
    %2 = vector.shape_cast %1 : vector<2x128xf32> to vector<1x2x128xf32>
    %3 = vector.broadcast %2 : vector<1x2x128xf32> to vector<2x2x128xf32>
    %4 = arith.addf %0, %3 : vector<2x2x128xf32>
    %c0_4 = arith.constant 0 : index
    %c0_5 = arith.constant 0 : index
    %c0_6 = arith.constant 0 : index
    %5 = vector.load %arg4[%c0_4, %c0_5, %c0_6] : memref<2x2x128xf32, #tpu.memory_space<vmem>>, vector<2x2x128xf32>
    tpu.vector_store %arg4[%c0_4, %c0_5, %c0_6], %4 {strides = array<i32>} : memref<2x2x128xf32, #tpu.memory_space<vmem>>, vector<2x2x128xf32>,
    return
  }
  func.func @transform_0(%arg0: i32, %arg1: i32) -> (i32, i32, i32) {
    %c0_i32 = arith.constant 0 : i32
    %c0_i32_0 = arith.constant 0 : i32
    return %arg1, %arg0, %c0_i32 : i32, i32, i32
  }
  func.func @transform_1(%arg0: i32, %arg1: i32) -> (i32, i32) {
    %c0_i32 = arith.constant 0 : i32
    %c0_i32_0 = arith.constant 0 : i32
    return %arg0, %c0_i32 : i32, i32
  }
  func.func @transform_2(%arg0: i32, %arg1: i32) -> (i32, i32, i32) {
    %c0_i32 = arith.constant 0 : i32
    %c0_i32_0 = arith.constant 0 : i32
    return %arg1, %arg0, %c0_i32 : i32, i32, i32
  }
}

</mosaic_0001>

<bundles_post_ra>
// kernel: tpu_custom_call.1
= control target key start
LH: loop header
LB: loop body
LE: loop exit
PB: predicated region body
PF: predicated region fallthrough
CT: control target
= control target key end

     0   :  { %7 = vsyncpa [#allocation3], 0  ;;  %s169_s0 = inlined_call_operand.hbm [shape: f32[2,2,128], index: 0, kind: input, shape index: {}]   ;;  %s170_s1 = inlined_call_operand.hbm [shape: f32[2,128], index: 1, kind: input, shape index: {}]   ;;  %s171_s2 = inlined_call_operand.hbm [shape: f32[2,2,128], index: 2, kind: output, shape index: {}]  }
   0x1   :  { %8 = vsyncpa [#allocation6], 0 }
   0x2   :  { %9 = vsyncpa [#allocation4], 0  ;;  %s134_s9 = smov [#allocation2]  }
   0x3   :  { %s15_s10 = sshll.u32 %s134_s9, 4  ;;  %s16_s10 = int_to_ptr.vmem [resolvable:$true] %s15_s10 }
   0x4   :  { %s76_s11 = scalar_lea.vmem %s16_s10, 64  ;;  %p81_p1 = scmp.lt.s32.totalorder %s16_s10, %s16_s10 }
   0x5   :  { %p77_p0 = scmp.ne.s32.totalorder %s16_s10, %s76_s11  ;;  %p82_p2 = scmp.lt.s32.totalorder %s76_s11, %s76_s11 }
   0x7   :  { %p83_p3 = por %p82_p2, %p81_p1 }
   0x9   :  { %p84_p4 = pnand %p83_p3, %p77_p0 }
   0xb   :  { %87 = shalt.err (!%p84_p4)
}
   0xc   :  { %s135_s12 = smov 32   ;;  %s136_s13 = smov 2  }
   0xd   :  { %21 = dma.hbm_to_vmem [thread:$0]  %s169_s0, 64, %s16_s10, [#allocation3], %s135_s12, %s135_s12, %s136_s13  }
   0xe   :  { %s137_s16 = smov [#allocation5]  }
   0xf   :  { %s28_s17 = sshll.u32 %s137_s16, 4  ;;  %s29_s17 = int_to_ptr.vmem [resolvable:$true] %s28_s17 }
  0x10   :  { %s96_s18 = scalar_lea.vmem %s29_s17, 32  ;;  %p101_p6 = scmp.lt.s32.totalorder %s29_s17, %s29_s17 }
  0x11   :  { %p97_p5 = scmp.ne.s32.totalorder %s29_s17, %s96_s18  ;;  %p102_p7 = scmp.lt.s32.totalorder %s96_s18, %s96_s18 }
  0x13   :  { %p103_p8 = por %p102_p7, %p101_p6 }
  0x15   :  { %p104_p9 = pnand %p103_p8, %p97_p5 }
  0x17   :  { %107 = shalt.err (!%p104_p9)
}
  0x18   :  { %31 = dma.hbm_to_vmem [thread:$0]  %s170_s1, 32, %s29_s17, [#allocation6]  }
  0x19   :  { %128 = dma.done.wait [#allocation3], 64  }
  0x1a   :  { %129 = vsyncadd [#allocation3], 4294967232 }
  0x1b   :  { %130 = dma.done.wait [#allocation6], 32  }
  0x1c   :  { %131 = vsyncadd [#allocation6], 4294967264  ;;  %s138_s21 = smov [#allocation7]   ;;  %v38_v0 = vld [vmem:[#allocation2] sm:$0x3] }
  0x1d   :  { %s50_s0 = sshll.u32 %s138_s21, 4  ;;  %v40_v1 = vld [vmem:[#allocation5] sm:$0x3]  ;;  %v39_v2 = vld [vmem:[#allocation2 + $0x2] sm:$0x3]  ;;  %s51_s0 = int_to_ptr.vmem [resolvable:$true] %s50_s0 }
  0x1e   :  { %v41_v3 = vadd.f32 %v40_v1, %v38_v0  ;;  %v42_v4 = vadd.f32 %v40_v1, %v39_v2  ;;  %s108_s22 = scalar_lea.vmem %s51_s0, 64  ;;  %p113_p11 = scmp.lt.s32.totalorder %s51_s0, %s51_s0 }
  0x1f   :  { %p109_p10 = scmp.ne.s32.totalorder %s51_s0, %s108_s22  ;;  %p114_p12 = scmp.lt.s32.totalorder %s108_s22, %s108_s22 }
  0x20   :  { %43 = vst [vmem:[#allocation7] sm:$0x3] %v41_v3  ;;  %44 = vst [vmem:[#allocation7 + $0x2] sm:$0x3] %v42_v4 }
  0x21   :  { %p115_p13 = por %p114_p12, %p113_p11 }
  0x23   :  { %p116_p0 = pnand %p115_p13, %p109_p10 }
  0x25   :  { %119 = shalt.err (!%p116_p0)
}
  0x26   :  { %56 = dma.vmem_to_hbm [thread:$0]  %s51_s0, 64, %s171_s2, [#allocation4], %s135_s12, %s135_s12, %s136_s13  }
  0x27   :  { %132 = dma.done.wait [#allocation4], 64  }
  0x28   :  { %133 = vsyncadd [#allocation4], 4294967232 }
  0x29   :  { %60 = vsyncpa [#allocation3], 1 }
  0x2a   :  { %61 = vsyncpa [#allocation6], 1 }
  0x2b   :  { %62 = vsyncpa [#allocation4], 1 }

</bundles_post_ra>
